<compile_context>
chip_gen: v7x
topology: tpu7x:2x2x1
jax: 0.10.0
libtpu: 0.0.40
codegen_flags: <defaults>
</compile_context>

<pallas_src>
import functools

import jax
import jax.numpy as jnp
from jax.experimental import pallas as pl
from jax.experimental.pallas import tpu as pltpu


# ----------------------------- Pallas kernel --------------------------------
def _gbn_kernel(x_ref, w_ref, b_ref, o_ref, *, eps, inv_m, inv_nm1):
    # Cast to f32 immediately so the statistics are computed in full precision
    # even for bf16 I/O.
    x = x_ref[...].astype(jnp.float32)                       # (B, G, cg, HW)

    # Per-(image, group) statistics: lane reduce (HW) then sublane reduce (cg).
    s = jnp.sum(x, axis=3, keepdims=True)                    # (B, G, cg, 1)
    mean = jnp.sum(s, axis=2, keepdims=True) * inv_m         # (B, G, 1, 1)
    d = x - mean
    sq = jnp.sum(d * d, axis=3, keepdims=True)               # (B, G, cg, 1)
    var = jnp.sum(sq, axis=2, keepdims=True) * inv_nm1       # unbiased (torch.std)
    inv = 1.0 / (jnp.sqrt(var) + eps)                        # only (B, G, 1, 1) divides

    # Fold per-group inverse std into the per-channel scale: one broadcast
    # multiply + one broadcast add over the full block.
    w = w_ref[...].astype(jnp.float32)                       # (1, G, cg, 1)
    b = b_ref[...].astype(jnp.float32)                       # (1, G, cg, 1)
    scale = inv * w                                          # (B, G, cg, 1)

    o_ref[...] = (d * scale + b).astype(o_ref.dtype)


# ----------------------------- wrapper ---------------------------------------
def group_batchnorm2d_pallas(x, weight, bias, *, group_num, eps=1e-10):
    N, C, H, W = x.shape
    assert C >= group_num and C % group_num == 0
    G = group_num
    cg = C // G
    HW = H * W
    M = cg * HW
    # torch.std (unbiased) over a single element is NaN; require > 1 explicitly.
    assert M > 1, "GroupBatchnorm2d needs more than one element per group"

    # Grouped 4-D layout: (N, G, cg, HW).  Native dtype, no value copy/cast.
    xg = x.reshape(N, G, cg, HW)
    wg = weight.reshape(1, G, cg, 1)          # tiny grid-invariant VMEM inputs
    bg = bias.reshape(1, G, cg, 1)

    # ---- VMEM budgeting (pipeline holds 2x input + 2x output blocks in the
    # I/O dtype plus ~2 f32 block-sized temporaries; leave headroom). ----
    itemsize = jnp.dtype(x.dtype).itemsize
    per_image_io = G * M * itemsize
    per_image_f32 = G * M * 4
    per_image_pipe = 4 * per_image_io + 2 * per_image_f32
    vmem_limit = 48 * 1024 * 1024             # fits v7x (64 MiB) and v5e/v6e (128 MiB)
    budget = int(vmem_limit * 0.75)           # headroom for Mosaic internals
    B = max(1, min(N, budget // per_image_pipe))
    if N >= 2:
        # Keep at least two grid steps so v7x's two TensorCores both get work.
        B = min(B, pl.cdiv(N, 2))
    grid = pl.cdiv(N, B)                      # ragged last block OK (writes dropped)

    kernel = functools.partial(_gbn_kernel, eps=float(eps),
                               inv_m=1.0 / float(M),
                               inv_nm1=1.0 / float(M - 1))

    elems = N * G * M
    out = pl.pallas_call(
        kernel,
        out_shape=jax.ShapeDtypeStruct((N, G, cg, HW), x.dtype),
        grid=(grid,),
        in_specs=[
            pl.BlockSpec((B, G, cg, HW), lambda i: (i, 0, 0, 0)),   # activations
            pl.BlockSpec((1, G, cg, 1), lambda i: (0, 0, 0, 0)),    # weight (invariant)
            pl.BlockSpec((1, G, cg, 1), lambda i: (0, 0, 0, 0)),    # bias   (invariant)
        ],
        out_specs=pl.BlockSpec((B, G, cg, HW), lambda i: (i, 0, 0, 0)),
        input_output_aliases={0: 0},          # output reuses the activation buffer
        compiler_params=pltpu.CompilerParams(
            dimension_semantics=("parallel",),        # batch axis is independent
            vmem_limit_bytes=vmem_limit),
        cost_estimate=pl.CostEstimate(
            flops=7 * elems,
            transcendentals=N * G,
            bytes_accessed=2 * elems * itemsize + 2 * C * 4),
    )(xg, wg, bg)
    return out.reshape(N, C, H, W)


# --------------------- pure-JAX reference (for checking) --------------------
def group_batchnorm2d_reference(x, weight, bias, *, group_num, eps=1e-10):
    N, C, H, W = x.shape
    xg = x.astype(jnp.float32).reshape(N, group_num, -1)
    mean = xg.mean(axis=2, keepdims=True)
    var = jnp.sum((xg - mean) ** 2, axis=2, keepdims=True) / (xg.shape[2] - 1)
    std = jnp.sqrt(var)                                      # torch.std (unbiased)
    xn = ((xg - mean) / (std + eps)).reshape(N, C, H, W)
    return xn * weight.reshape(1, C, 1, 1) + bias.reshape(1, C, 1, 1)


# ----------------------------------- main ------------------------------------
if __name__ == "__main__":
    N, C, H, W = 2, 16, 16, 16
    group_num, eps = 8, 1e-10

    key = jax.random.PRNGKey(0)
    kx, kw = jax.random.split(key, 2)
    x = jax.random.normal(kx, (N, C, H, W), jnp.float32)
    weight = jax.random.normal(kw, (C, 1, 1), jnp.float32)   # torch.randn init
    bias = jnp.zeros((C, 1, 1), jnp.float32)                 # torch.zeros init

    gbn = jax.jit(group_batchnorm2d_pallas, static_argnames=("group_num", "eps"))
    out = gbn(x, weight, bias, group_num=group_num, eps=eps)
    out = jax.block_until_ready(out)

    ref = group_batchnorm2d_reference(x, weight, bias, group_num=group_num, eps=eps)
    err = float(jnp.max(jnp.abs(out.astype(jnp.float32) - ref)))
    assert out.shape == (N, C, H, W)
    assert err < 1e-3, f"max abs error too large: {err}"
    print("KERNEL_OK")
</pallas_src>

<mosaic_0001>
module attributes {stable_mosaic.version = 11 : i64} {
  func.func @_gbn_kernel(%arg0: i32, %arg1: memref<1x8x2x256xf32, #tpu.memory_space<vmem>>, %arg2: memref<1x8x2x1xf32, #tpu.memory_space<vmem>>, %arg3: memref<1x8x2x1xf32, #tpu.memory_space<vmem>>, %arg4: memref<1x8x2x256xf32, #tpu.memory_space<vmem>>) attributes {dimension_semantics = [#tpu.dimension_semantics<parallel>], iteration_bounds = array<i64: 2>, scalar_prefetch = 0 : i64, scratch_operands = 0 : i64, tpu.core_type = #tpu.core_type<tc>, window_params = [{transform_indices = @transform_0, window_bounds = array<i64: 1, 8, 2, 256>}, {pipeline_mode = #tpu.pipeline_mode<synchronous>, transform_indices = @transform_1, window_bounds = array<i64: 1, 8, 2, 1>}, {pipeline_mode = #tpu.pipeline_mode<synchronous>, transform_indices = @transform_2, window_bounds = array<i64: 1, 8, 2, 1>}, {transform_indices = @transform_3, window_bounds = array<i64: 1, 8, 2, 256>}]} {
    %c0 = arith.constant 0 : index
    %c0_0 = arith.constant 0 : index
    %c0_1 = arith.constant 0 : index
    %c0_2 = arith.constant 0 : index
    %0 = vector.load %arg1[%c0, %c0_0, %c0_1, %c0_2] : memref<1x8x2x256xf32, #tpu.memory_space<vmem>>, vector<1x8x2x256xf32>
    %cst = arith.constant dense<0.000000e+00> : vector<1x8x2xf32>
    %1 = vector.multi_reduction <add>, %0, %cst [3] : vector<1x8x2x256xf32> to vector<1x8x2xf32>
    %2 = vector.shape_cast %1 : vector<1x8x2xf32> to vector<1x8x2x1xf32>
    %cst_3 = arith.constant dense<0.000000e+00> : vector<1x8x1xf32>
    %3 = vector.multi_reduction <add>, %2, %cst_3 [2] : vector<1x8x2x1xf32> to vector<1x8x1xf32>
    %4 = vector.shape_cast %3 : vector<1x8x1xf32> to vector<1x8x1x1xf32>
    %cst_4 = arith.constant 0.001953125 : f32
    %5 = vector.broadcast %cst_4 : f32 to vector<1x8x1x1xf32>
    %6 = arith.mulf %4, %5 : vector<1x8x1x1xf32>
    %7 = vector.broadcast %6 : vector<1x8x1x1xf32> to vector<1x8x2x256xf32>
    %8 = arith.subf %0, %7 : vector<1x8x2x256xf32>
    %9 = arith.mulf %8, %8 : vector<1x8x2x256xf32>
    %cst_5 = arith.constant dense<0.000000e+00> : vector<1x8x2xf32>
    %10 = vector.multi_reduction <add>, %9, %cst_5 [3] : vector<1x8x2x256xf32> to vector<1x8x2xf32>
    %11 = vector.shape_cast %10 : vector<1x8x2xf32> to vector<1x8x2x1xf32>
    %cst_6 = arith.constant dense<0.000000e+00> : vector<1x8x1xf32>
    %12 = vector.multi_reduction <add>, %11, %cst_6 [2] : vector<1x8x2x1xf32> to vector<1x8x1xf32>
    %13 = vector.shape_cast %12 : vector<1x8x1xf32> to vector<1x8x1x1xf32>
    %cst_7 = arith.constant 0.00195694715 : f32
    %14 = vector.broadcast %cst_7 : f32 to vector<1x8x1x1xf32>
    %15 = arith.mulf %13, %14 : vector<1x8x1x1xf32>
    %16 = math.sqrt %15 : vector<1x8x1x1xf32>
    %cst_8 = arith.constant 1.000000e-10 : f32
    %17 = vector.broadcast %cst_8 : f32 to vector<1x8x1x1xf32>
    %18 = arith.addf %16, %17 : vector<1x8x1x1xf32>
    %cst_9 = arith.constant 1.000000e+00 : f32
    %19 = vector.broadcast %cst_9 : f32 to vector<1x8x1x1xf32>
    %20 = arith.divf %19, %18 : vector<1x8x1x1xf32>
    %c0_10 = arith.constant 0 : index
    %c0_11 = arith.constant 0 : index
    %c0_12 = arith.constant 0 : index
    %c0_13 = arith.constant 0 : index
    %21 = vector.load %arg2[%c0_10, %c0_11, %c0_12, %c0_13] : memref<1x8x2x1xf32, #tpu.memory_space<vmem>>, vector<1x8x2x1xf32>
    %c0_14 = arith.constant 0 : index
    %c0_15 = arith.constant 0 : index
    %c0_16 = arith.constant 0 : index
    %c0_17 = arith.constant 0 : index
    %22 = vector.load %arg3[%c0_14, %c0_15, %c0_16, %c0_17] : memref<1x8x2x1xf32, #tpu.memory_space<vmem>>, vector<1x8x2x1xf32>
    %23 = vector.broadcast %20 : vector<1x8x1x1xf32> to vector<1x8x2x1xf32>
    %24 = arith.mulf %23, %21 : vector<1x8x2x1xf32>
    %25 = vector.broadcast %24 : vector<1x8x2x1xf32> to vector<1x8x2x256xf32>
    %26 = arith.mulf %8, %25 : vector<1x8x2x256xf32>
    %27 = vector.broadcast %22 : vector<1x8x2x1xf32> to vector<1x8x2x256xf32>
    %28 = arith.addf %26, %27 : vector<1x8x2x256xf32>
    %c0_18 = arith.constant 0 : index
    %c0_19 = arith.constant 0 : index
    %c0_20 = arith.constant 0 : index
    %c0_21 = arith.constant 0 : index
    %29 = vector.load %arg4[%c0_18, %c0_19, %c0_20, %c0_21] : memref<1x8x2x256xf32, #tpu.memory_space<vmem>>, vector<1x8x2x256xf32>
    tpu.vector_store %arg4[%c0_18, %c0_19, %c0_20, %c0_21], %28 {strides = array<i32>} : memref<1x8x2x256xf32, #tpu.memory_space<vmem>>, vector<1x8x2x256xf32>,
    return
  }
  func.func @transform_0(%arg0: i32) -> (i32, i32, i32, i32) {
    %c0_i32 = arith.constant 0 : i32
    %c0_i32_0 = arith.constant 0 : i32
    %c0_i32_1 = arith.constant 0 : i32
    %c0_i32_2 = arith.constant 0 : i32
    return %arg0, %c0_i32, %c0_i32_0, %c0_i32_1 : i32, i32, i32, i32
  }
  func.func @transform_1(%arg0: i32) -> (i32, i32, i32, i32) {
    %c0_i32 = arith.constant 0 : i32
    %c0_i32_0 = arith.constant 0 : i32
    %c0_i32_1 = arith.constant 0 : i32
    %c0_i32_2 = arith.constant 0 : i32
    %c0_i32_3 = arith.constant 0 : i32
    return %c0_i32, %c0_i32_0, %c0_i32_1, %c0_i32_2 : i32, i32, i32, i32
  }
  func.func @transform_2(%arg0: i32) -> (i32, i32, i32, i32) {
    %c0_i32 = arith.constant 0 : i32
    %c0_i32_0 = arith.constant 0 : i32
    %c0_i32_1 = arith.constant 0 : i32
    %c0_i32_2 = arith.constant 0 : i32
    %c0_i32_3 = arith.constant 0 : i32
    return %c0_i32, %c0_i32_0, %c0_i32_1, %c0_i32_2 : i32, i32, i32, i32
  }
  func.func @transform_3(%arg0: i32) -> (i32, i32, i32, i32) {
    %c0_i32 = arith.constant 0 : i32
    %c0_i32_0 = arith.constant 0 : i32
    %c0_i32_1 = arith.constant 0 : i32
    %c0_i32_2 = arith.constant 0 : i32
    return %arg0, %c0_i32, %c0_i32_0, %c0_i32_1 : i32, i32, i32, i32
  }
}

</mosaic_0001>

<bundles_post_ra>
// kernel: group_batchnorm2d_pallas.1
= control target key start
LH: loop header
LB: loop body
LE: loop exit
PB: predicated region body
PF: predicated region fallthrough
CT: control target
= control target key end

     0   :  { %s1044_s12 = smov 0   ;;  %s1300_s0 = inlined_call_operand.vmem [shape: f32[2,8,2,256], index: 0, kind: input, shape index: {}, may-alias: {0,3}]   ;;  %s1301_s1 = inlined_call_operand.vmem [shape: f32[1,8,2,1], index: 1, kind: input, shape index: {}]   ;;  %s1302_s2 = inlined_call_operand.vmem [shape: f32[1,8,2,1], index: 2, kind: input, shape index: {}]   ;;  %s1303_s3 = inlined_call_operand.vmem [shape: f32[2,8,2,256], index: 3, kind: output, shape index: {}, may-alias: {0,3}]  }
   0x1 LB: > { %s955_s13 = sadd.s32 4294967295, %s1019_s12   ;;  %p959_p0 = scmp.ge.s32.totalorder %s1019_s12, 1  ;;  %s1019_s12 = sphi %s1044_s12, %s13_s12  }
   0x2   : > { %p137_p1 = scmp.lt.s32.totalorder %s1019_s12, 3 }
   0x4   : > { %p138_p2 = pnand %p959_p0, %p137_p1 }
   0x5   : > { %p161_p3 = scmp.lt.s32.totalorder (!%p138_p2), %s955_s13, 1  ;;  %v190_v0 = vlaneseq (!%p138_p2)  ;;  %v1021_v1 = vmov (!%p138_p2), 1983009808   ;;  %vm267_vm0 = vcmask (!%p138_p2), 1041408  }
   0x6   : > { %141 = sbr.rel (%p138_p2) target bundleno = 546 (0x222), region = 32  ;;  %v188_v2 = vunpack.c.l.s4 (!%p138_p2), %v1021_v1 }
   0x7   : > { %v1054_v3 = vshrl.u32 (!%p138_p2), %v190_v0, 7 }
   0x8   : > { %v189_v4 = vunpack.c.0.s8 (!%p138_p2), %v188_v2 }
   0xa   : > { %v1063_v5 = vsub.s32 (!%p138_p2), %v189_v4, %v1054_v3 }
   0xd   : > { %s1305_s13 = smov (!%p161_p3, %s955_s13), 1 }
   0xe   : > { %s966_s14 = sshll.u32 %s1305_s13, 5 }
   0xf   : > { %s165_s17 = scalar_lea.vmem %s1300_s0, %s966_s14  ;;  %s1280_s28 = scalar_lea.vmem %s1303_s3, %s966_s14 }
  0x10   : > { %v1065_v6 = vld [vmem:[%s165_s17 + $0x8] sm:$0xf]  ;;  %v1067_v7 = vld [vmem:[%s165_s17] sm:$0xf]  ;;  %v1069_v8 = vld [vmem:[%s165_s17 + $0xc] sm:$0xf] }
  0x11   : > { %v209_v9 = vrot.slane %v1065_v6, %v1063_v5  ;;  %v193_v10 = vrot.slane %v1067_v7, %v1063_v5  ;;  %v217_v11 = vrot.slane %v1069_v8, %v1063_v5  ;;  %v1077_v12 = vld [vmem:[%s165_s17 + $0x4] sm:$0xf]  ;;  %v1079_v13 = vld [vmem:[%s165_s17 + $0x10] sm:$0xf]  ;;  %v1081_v14 = vld [vmem:[%s165_s17 + $0x14] sm:$0xf] }
  0x12   : > { %v201_v15 = vrot.slane %v1077_v12, %v1063_v5  ;;  %v225_v16 = vrot.slane %v1079_v13, %v1063_v5  ;;  %v233_v17 = vrot.slane %v1081_v14, %v1063_v5  ;;  %v1092_v25 = vld [vmem:[%s165_s17 + $0x18] sm:$0xf]  ;;  %v1097_v30 = vld [vmem:[%s165_s17 + $0x1c] sm:$0xf] }
  0x13   : > { %v210_v18 = vcombine.high %v209_v9, %v209_v9  ;;  %v278_v19 = vsel %vm267_vm0, %v209_v9, 0.0  ;;  %v194_v20 = vcombine.high %v193_v10, %v193_v10  ;;  %v268_v21 = vsel %vm267_vm0, %v193_v10, 0.0 }
  0x14   : > { %v218_v22 = vcombine.high %v217_v11, %v217_v11  ;;  %v283_v23 = vsel %vm267_vm0, %v217_v11, 0.0  ;;  %v202_v24 = vcombine.high %v201_v15, %v201_v15  ;;  %v273_v28 = vsel %vm267_vm0, %v201_v15, 0.0 }
  0x15   : > { %v279_v26 = vsel %vm267_vm0, %v210_v18, 0.0  ;;  %v269_v27 = vsel %vm267_vm0, %v194_v20, 0.0  ;;  %v226_v29 = vcombine.high %v225_v16, %v225_v16  ;;  %v234_v36 = vcombine.high %v233_v17, %v233_v17 }
  0x16   : > { %v280_v31 = vadd.f32 %v279_v26, %v278_v19  ;;  %v270_v32 = vadd.f32 %v269_v27, %v268_v21  ;;  %v284_v33 = vsel %vm267_vm0, %v218_v22, 0.0  ;;  %v274_v34 = vsel %vm267_vm0, %v202_v24, 0.0 }
  0x17   : > { %v285_v35 = vadd.f32 %v284_v33, %v283_v23  ;;  %v275_v37 = vadd.f32 %v274_v34, %v273_v28  ;;  %v241_v38 = vrot.slane %v1092_v25, %v1063_v5  ;;  %v249_v39 = vrot.slane %v1097_v30, %v1063_v5 }
  0x18   : > { %281 = vadd.xlane.f32.xlu1 %v280_v31  ;;  %271 = vadd.xlane.f32.xlu0 %v270_v32  ;;  %v288_v40 = vsel %vm267_vm0, %v225_v16, 0.0  ;;  %v289_v41 = vsel %vm267_vm0, %v226_v29, 0.0  ;;  %v293_v42 = vsel %vm267_vm0, %v233_v17, 0.0  ;;  %v294_v43 = vsel %vm267_vm0, %v234_v36, 0.0 }
  0x19   : > { %v242_v44 = vcombine.high %v241_v38, %v241_v38  ;;  %v250_v45 = vcombine.high %v249_v39, %v249_v39  ;;  %v290_v46 = vadd.f32 %v289_v41, %v288_v40  ;;  %v295_v47 = vadd.f32 %v294_v43, %v293_v42 }
  0x1a   : > { %v298_v48 = vsel %vm267_vm0, %v241_v38, 0.0  ;;  %v303_v50 = vsel %vm267_vm0, %v249_v39, 0.0 }
  0x1b   : > { %v299_v49 = vsel %vm267_vm0, %v242_v44, 0.0  ;;  %v304_v51 = vsel %vm267_vm0, %v250_v45, 0.0 }
  0x1c   : > { %286 = vadd.xlane.f32.xlu1 %v285_v35  ;;  %276 = vadd.xlane.f32.xlu0 %v275_v37  ;;  %v300_v52 = vadd.f32 %v299_v49, %v298_v48  ;;  %v305_v53 = vadd.f32 %v304_v51, %v303_v50 }
  0x20   : > { %291 = vadd.xlane.f32.xlu0 %v290_v46  ;;  %296 = vadd.xlane.f32.xlu1 %v295_v47 }
  0x24   : > { %301 = vadd.xlane.f32.xlu0 %v300_v52  ;;  %306 = vadd.xlane.f32.xlu1 %v305_v53 }
  0xa5   : > { %v282_v54 = vpop.xlane.xlu1 %281  ;;  %v272_v55 = vpop.xlane.xlu0 %271 }
  0xa6   : > { %v322_v56 = vsel %vm267_vm0, %v282_v54, 0.0  ;;  %v308_v57 = vsel %vm267_vm0, %v272_v55, 0.0 }
  0xa7   : > { %v323_v58 = vrot.slane %v322_v56, 4  ;;  %v309_v59 = vrot.slane %v308_v57, 4 }
  0xa9   : > { %v324_v60 = vadd.f32 %v323_v58, %v322_v56  ;;  %v310_v61 = vadd.f32 %v309_v59, %v308_v57  ;;  %v287_v62 = vpop.xlane.xlu1 %286  ;;  %v277_v63 = vpop.xlane.xlu0 %276 }
  0xaa   : > { %v329_v0 = vsel %vm267_vm0, %v287_v62, 0.0  ;;  %v315_v1 = vsel %vm267_vm0, %v277_v63, 0.0 }
  0xab   : > { %v325_v2 = vrot.slane %v324_v60, 2  ;;  %v311_v4 = vrot.slane %v310_v61, 2  ;;  %v330_v9 = vrot.slane %v329_v0, 4  ;;  %v316_v10 = vrot.slane %v315_v1, 4 }
  0xad   : > { %v326_v11 = vadd.f32 %v325_v2, %v324_v60  ;;  %v312_v15 = vadd.f32 %v311_v4, %v310_v61  ;;  %v331_v16 = vadd.f32 %v330_v9, %v329_v0  ;;  %v317_v17 = vadd.f32 %v316_v10, %v315_v1  ;;  %v292_v18 = vpop.xlane.xlu0 %291  ;;  %v297_v19 = vpop.xlane.xlu1 %296 }
  0xae   : > { %v336_v20 = vsel %vm267_vm0, %v292_v18, 0.0  ;;  %v343_v21 = vsel %vm267_vm0, %v297_v19, 0.0 }
  0xaf   : > { %v327_v22 = vrot.slane %v326_v11, 1  ;;  %v313_v23 = vrot.slane %v312_v15, 1  ;;  %v332_v24 = vrot.slane %v331_v16, 2  ;;  %v318_v26 = vrot.slane %v317_v17, 2 }
  0xb0   : > { %v337_v27 = vrot.slane %v336_v20, 4  ;;  %v344_v28 = vrot.slane %v343_v21, 4 }
  0xb1   : > { %v328_v29 = vadd.f32 %v327_v22, %v326_v11  ;;  %v314_v31 = vadd.f32 %v313_v23, %v312_v15  ;;  %v333_v32 = vadd.f32 %v332_v24, %v331_v16  ;;  %v319_v33 = vadd.f32 %v318_v26, %v317_v17  ;;  %v302_v34 = vpop.xlane.xlu0 %301  ;;  %v307_v35 = vpop.xlane.xlu1 %306 }
  0xb2   : > { %v338_v36 = vadd.f32 %v337_v27, %v336_v20  ;;  %v345_v37 = vadd.f32 %v344_v28, %v343_v21  ;;  %v350_v38 = vsel %vm267_vm0, %v302_v34, 0.0  ;;  %v357_v39 = vsel %vm267_vm0, %v307_v35, 0.0 }
  0xb3   : > { %v366_v40 = vmul.f32 0.001953125, %v328_v29  ;;  %v364_v41 = vmul.f32 0.001953125, %v314_v31  ;;  %v334_v42 = vrot.slane %v333_v32, 1  ;;  %v320_v43 = vrot.slane %v319_v33, 1 }
  0xb4   : > { %v339_v44 = vrot.slane %v338_v36, 2  ;;  %v346_v45 = vrot.slane %v345_v37, 2  ;;  %v351_v46 = vrot.slane %v350_v38, 4  ;;  %v358_v47 = vrot.slane %v357_v39, 4 }
  0xb5   : > { %v1122_v48 = vsub.f32 %v1065_v6, %v366_v40  ;;  %v1125_v49 = vsub.f32 %v1067_v7, %v364_v41  ;;  %v335_v50 = vadd.f32 %v334_v42, %v333_v32  ;;  %v321_v51 = vadd.f32 %v320_v43, %v319_v33 }
  0xb6   : > { %v340_v52 = vadd.f32 %v339_v44, %v338_v36  ;;  %v347_v53 = vadd.f32 %v346_v45, %v345_v37  ;;  %v352_v54 = vadd.f32 %v351_v46, %v350_v38  ;;  %v359_v55 = vadd.f32 %v358_v47, %v357_v39 }
  0xb7   : > { %v367_v56 = vmul.f32 0.001953125, %v335_v50  ;;  %v365_v57 = vmul.f32 0.001953125, %v321_v51  ;;  %v380_v58 = vmul.f32 %v1125_v49, %v1125_v49  ;;  %v382_v59 = vmul.f32 %v1122_v48, %v1122_v48 }
  0xb8   : > { %v341_v60 = vrot.slane %v340_v52, 1  ;;  %v348_v6 = vrot.slane %v347_v53, 1  ;;  %v353_v61 = vrot.slane %v352_v54, 2  ;;  %v360_v62 = vrot.slane %v359_v55, 2 }
  0xb9   : > { %v1132_v7 = vsub.f32 %v1069_v8, %v367_v56  ;;  %v1135_v63 = vsub.f32 %v1077_v12, %v365_v57  ;;  %v402_v0 = vrot.slane %v380_v58, %v1063_v5  ;;  %v418_v1 = vrot.slane %v382_v59, %v1063_v5 }
  0xba   : > { %v342_v2 = vadd.f32 %v341_v60, %v340_v52  ;;  %v349_v4 = vadd.f32 %v348_v6, %v347_v53  ;;  %v354_v9 = vadd.f32 %v353_v61, %v352_v54  ;;  %v361_v10 = vadd.f32 %v360_v62, %v359_v55 }
  0xbb   : > { %v403_v11 = vcombine.high %v402_v0, %v402_v0  ;;  %v476_v15 = vsel %vm267_vm0, %v402_v0, 0.0  ;;  %v419_v16 = vcombine.high %v418_v1, %v418_v1  ;;  %v486_v12 = vsel %vm267_vm0, %v418_v1, 0.0 }
  0xbc   : > { %v368_v17 = vmul.f32 0.001953125, %v342_v2  ;;  %v369_v18 = vmul.f32 0.001953125, %v349_v4  ;;  %v355_v19 = vrot.slane %v354_v9, 1  ;;  %v362_v8 = vrot.slane %v361_v10, 1 }
  0xbd   : > { %v477_v20 = vsel %vm267_vm0, %v403_v11, 0.0  ;;  %v381_v21 = vmul.f32 %v1135_v63, %v1135_v63  ;;  %v383_v22 = vmul.f32 %v1132_v7, %v1132_v7  ;;  %v487_v29 = vsel %vm267_vm0, %v419_v16, 0.0  ;;  %v669_v11 = vld [vmem:[%s1302_s2 + $0x2] sm:$0x3]  ;;  %v672_v16 = vld [vmem:[%s1302_s2 + $0x8] sm:$0x3] }
  0xbe   : > { %v1147_v23 = vsub.f32 %v1079_v13, %v368_v17  ;;  %v1150_v24 = vsub.f32 %v1081_v14, %v369_v18  ;;  %v356_v26 = vadd.f32 %v355_v19, %v354_v9  ;;  %v363_v27 = vadd.f32 %v362_v8, %v361_v10  ;;  %v668_v9 = vld [vmem:[%s1302_s2] sm:$0x3]  ;;  %v670_v10 = vld [vmem:[%s1302_s2 + $0x4] sm:$0x3]  ;;  %v673_v17 = vld [vmem:[%s1302_s2 + $0xa] sm:$0x3] }
  0xbf   : > { %v478_v28 = vadd.f32 %v477_v20, %v476_v15  ;;  %v410_v31 = vrot.slane %v381_v21, %v1063_v5  ;;  %v426_v32 = vrot.slane %v383_v22, %v1063_v5  ;;  %v488_v41 = vadd.f32 %v487_v29, %v486_v12  ;;  %v671_v15 = vld [vmem:[%s1302_s2 + $0x6] sm:$0x3] }
  0xc0   : > { %v370_v33 = vmul.f32 0.001953125, %v356_v26  ;;  %v371_v34 = vmul.f32 0.001953125, %v363_v27  ;;  %v384_v35 = vmul.f32 %v1147_v23, %v1147_v23  ;;  %v385_v13 = vmul.f32 %v1150_v24, %v1150_v24 }
  0xc1   : > { %479 = vadd.xlane.f32.xlu0 %v478_v28  ;;  %v411_v14 = vcombine.high %v410_v31, %v410_v31  ;;  %v427_v36 = vcombine.high %v426_v32, %v426_v32  ;;  %v481_v42 = vsel %vm267_vm0, %v410_v31, 0.0  ;;  %v491_v45 = vsel %vm267_vm0, %v426_v32, 0.0 }
  0xc2   : > { %v1160_v37 = vsub.f32 %v1092_v25, %v370_v33  ;;  %v1163_v38 = vsub.f32 %v1097_v30, %v371_v34  ;;  %v434_v39 = vrot.slane %v384_v35, %v1063_v5  ;;  %v442_v40 = vrot.slane %v385_v13, %v1063_v5 }
  0xc3   : > { %v482_v43 = vsel %vm267_vm0, %v411_v14, 0.0  ;;  %v492_v25 = vsel %vm267_vm0, %v427_v36, 0.0 }
  0xc4   : > { %v483_v44 = vadd.f32 %v482_v43, %v481_v42  ;;  %v435_v46 = vcombine.high %v434_v39, %v434_v39  ;;  %v496_v47 = vsel %vm267_vm0, %v434_v39, 0.0  ;;  %v443_v30 = vcombine.high %v442_v40, %v442_v40 }
  0xc5   : > { %489 = vadd.xlane.f32.xlu0 %v488_v41  ;;  %v386_v50 = vmul.f32 %v1160_v37, %v1160_v37  ;;  %v387_v51 = vmul.f32 %v1163_v38, %v1163_v38  ;;  %v501_v53 = vsel %vm267_vm0, %v442_v40, 0.0  ;;  %v493_v58 = vadd.f32 %v492_v25, %v491_v45 }
  0xc6   : > { %484 = vadd.xlane.f32.xlu1 %v483_v44  ;;  %v497_v52 = vsel %vm267_vm0, %v435_v46, 0.0  ;;  %v502_v55 = vsel %vm267_vm0, %v443_v30, 0.0 }
  0xc7   : > { %v498_v54 = vadd.f32 %v497_v52, %v496_v47  ;;  %v450_v56 = vrot.slane %v386_v50, %v1063_v5  ;;  %v458_v57 = vrot.slane %v387_v51, %v1063_v5  ;;  %v503_v61 = vadd.f32 %v502_v55, %v501_v53 }
  0xc8   : > { %v1022_v5 = vmov 0  }
  0xc9   : > { %499 = vadd.xlane.f32.xlu0 %v498_v54  ;;  %v451_v59 = vcombine.high %v450_v56, %v450_v56  ;;  %v506_v60 = vsel %vm267_vm0, %v450_v56, 0.0  ;;  %v459_v6 = vcombine.high %v458_v57, %v458_v57  ;;  %v511_v0 = vsel %vm267_vm0, %v458_v57, 0.0  ;;  %979 = vset.pattern.permute.xlu1 %v1022_v5 }
  0xca   : > { %494 = vadd.xlane.f32.xlu1 %v493_v58  ;;  %980 = vset.pattern.permute.xlu0 %v1022_v5 }
  0xcb   : > { %v507_v62 = vsel %vm267_vm0, %v451_v59, 0.0  ;;  %v512_v1 = vsel %vm267_vm0, %v459_v6, 0.0 }
  0xcc   : > { %v508_v2 = vadd.f32 %v507_v62, %v506_v60  ;;  %v513_v4 = vadd.f32 %v512_v1, %v511_v0 }
  0xce   : > { %504 = vadd.xlane.f32.xlu1 %v503_v61  ;;  %509 = vadd.xlane.f32.xlu0 %v508_v2 }
  0xd2   : > { %514 = vadd.xlane.f32.xlu1 %v513_v4 }
  0xe3   : > { %790 = vperm.xlu1 %979, %v668_v9  }
  0xe4   : > { %794 = vperm.xlu0 %980, %v669_v11  }
  0xe7   : > { %798 = vperm.xlu1 %979, %v670_v10  }
  0xe8   : > { %802 = vperm.xlu0 %980, %v671_v15  }
  0xeb   : > { %806 = vperm.xlu1 %979, %v672_v16  }
  0xec   : > { %810 = vperm.xlu0 %980, %v673_v17  }
 0x14e   : > { %v480_v18 = vpop.xlane.xlu0 %479 }
 0x14f   : > { %v516_v19 = vsel %vm267_vm0, %v480_v18, 0.0 }
 0x150   : > { %v517_v8 = vrot.slane %v516_v19, 4 }
 0x152   : > { %v518_v20 = vadd.f32 %v517_v8, %v516_v19  ;;  %v490_v12 = vpop.xlane.xlu0 %489 }
 0x153   : > { %v485_v21 = vpop.xlane.xlu1 %484  ;;  %v530_v22 = vsel %vm267_vm0, %v490_v12, 0.0 }
 0x154   : > { %v519_v26 = vrot.slane %v518_v20, 2  ;;  %v523_v27 = vsel %vm267_vm0, %v485_v21, 0.0  ;;  %v531_v28 = vrot.slane %v530_v22, 4 }
 0x155   : > { %v524_v29 = vrot.slane %v523_v27, 4 }
 0x156   : > { %v520_v31 = vadd.f32 %v519_v26, %v518_v20  ;;  %v532_v32 = vadd.f32 %v531_v28, %v530_v22  ;;  %v500_v33 = vpop.xlane.xlu0 %499 }
 0x157   : > { %v525_v34 = vadd.f32 %v524_v29, %v523_v27  ;;  %v495_v35 = vpop.xlane.xlu1 %494  ;;  %v544_v13 = vsel %vm267_vm0, %v500_v33, 0.0 }
 0x158   : > { %v521_v14 = vrot.slane %v520_v31, 1  ;;  %v533_v36 = vrot.slane %v532_v32, 2  ;;  %v537_v39 = vsel %vm267_vm0, %v495_v35, 0.0  ;;  %v545_v40 = vrot.slane %v544_v13, 4 }
 0x159   : > { %v526_v41 = vrot.slane %v525_v34, 2  ;;  %v538_v42 = vrot.slane %v537_v39, 4 }
 0x15a   : > { %v522_v43 = vadd.f32 %v521_v14, %v520_v31  ;;  %v534_v44 = vadd.f32 %v533_v36, %v532_v32  ;;  %v546_v45 = vadd.f32 %v545_v40, %v544_v13 }
 0x15b   : > { %v527_v46 = vadd.f32 %v526_v41, %v525_v34  ;;  %v539_v47 = vadd.f32 %v538_v42, %v537_v39  ;;  %v505_v25 = vpop.xlane.xlu1 %504  ;;  %v510_v30 = vpop.xlane.xlu0 %509 }
 0x15c   : > { %v572_v50 = vmul.f32 0.0019569471, %v522_v43  ;;  %v535_v51 = vrot.slane %v534_v44, 1  ;;  %v547_v52 = vrot.slane %v546_v45, 2  ;;  %v551_v53 = vsel %vm267_vm0, %v505_v25, 0.0 }
 0x15d   : > { %v528_v54 = vrot.slane %v527_v46, 1  ;;  %v540_v55 = vrot.slane %v539_v47, 2  ;;  %v552_v56 = vrot.slane %v551_v53, 4  ;;  %v558_v57 = vsel %vm267_vm0, %v510_v30, 0.0 }
 0x15e   : > { %981 = vrsqrt.f32 %v572_v50  ;;  %v536_v58 = vadd.f32 %v535_v51, %v534_v44  ;;  %v548_v59 = vadd.f32 %v547_v52, %v546_v45  ;;  %v559_v60 = vrot.slane %v558_v57, 4 }
 0x15f   : > { %v529_v6 = vadd.f32 %v528_v54, %v527_v46  ;;  %v541_v61 = vadd.f32 %v540_v55, %v539_v47  ;;  %v553_v62 = vadd.f32 %v552_v56, %v551_v53  ;;  %v515_v0 = vpop.xlane.xlu1 %514  ;;  %vm582_vm1 = vcmp.eq.f32.partialorder %v572_v50, inf }
 0x160   : > { %v574_v1 = vmul.f32 0.0019569471, %v536_v58  ;;  %v549_v2 = vrot.slane %v548_v59, 1  ;;  %v560_v4 = vadd.f32 %v559_v60, %v558_v57  ;;  %v565_v5 = vsel %vm267_vm0, %v515_v0, 0.0 }
 0x161   : > { %v573_v9 = vmul.f32 0.0019569471, %v529_v6  ;;  %v542_v10 = vrot.slane %v541_v61, 1  ;;  %v554_v11 = vrot.slane %v553_v62, 2  ;;  %v566_v15 = vrot.slane %v565_v5, 4 }
 0x162   : > { %983 = vrsqrt.f32 %v574_v1  ;;  %v550_v16 = vadd.f32 %v549_v2, %v548_v59  ;;  %v561_v17 = vrot.slane %v560_v4, 2  ;;  %v585_v14 = vand.u32 2147483648, %v572_v50 }
 0x163   : > { %985 = vrsqrt.f32 %v573_v9  ;;  %v543_v18 = vadd.f32 %v542_v10, %v541_v61  ;;  %v555_v19 = vadd.f32 %v554_v11, %v553_v62  ;;  %v567_v8 = vadd.f32 %v566_v15, %v565_v5 }
 0x164   : > { %v1211_v20 = vmul.f32 0.0019569471, %v550_v16  ;;  %v562_v12 = vadd.f32 %v561_v17, %v560_v4  ;;  %vm584_vm2 = vcmp.eq.f32.partialorder %v572_v50, 0.0  ;;  %vm589_vm3 = vcmp.eq.f32.partialorder %v573_v9, inf }
 0x165   : > { %v575_v21 = vmul.f32 0.0019569471, %v543_v18  ;;  %v556_v22 = vrot.slane %v555_v19, 1  ;;  %v568_v26 = vrot.slane %v567_v8, 2  ;;  %vm596_vm4 = vcmp.eq.f32.partialorder %v574_v1, inf }
 0x166   : > { %987 = vrsqrt.f32 %v1211_v20  ;;  %v563_v27 = vrot.slane %v562_v12, 1  ;;  %v599_v47 = vand.u32 2147483648, %v574_v1  ;;  %v592_v25 = vand.u32 2147483648, %v573_v9 }
 0x167   : > { %989 = vrsqrt.f32 %v575_v21  ;;  %v557_v28 = vadd.f32 %v556_v22, %v555_v19  ;;  %v569_v29 = vadd.f32 %v568_v26, %v567_v8  ;;  %vm598_vm5 = vcmp.eq.f32.partialorder %v574_v1, 0.0 }
 0x168   : > { %v982_v31 = vpop.eup %981  ;;  %v564_v32 = vadd.f32 %v563_v27, %v562_v12  ;;  %vm591_vm6 = vcmp.eq.f32.partialorder %v573_v9, 0.0  ;;  %vm603_vm7 = vcmp.eq.f32.partialorder %v575_v21, inf  ;;  %v606_v59 = vand.u32 2147483648, %v575_v21  ;;  %v675_v27 = vld [vmem:[%s1302_s2 + $0xe] sm:$0x3] }
 0x169   : > { %v1214_v33 = vmul.f32 0.0019569471, %v557_v28  ;;  %v570_v34 = vrot.slane %v569_v29, 1  ;;  %v581_v35 = vmul.f32 %v982_v31, %v572_v50  ;;  %vm610_vm8 = vcmp.eq.f32.partialorder %v1211_v20, inf }
 0x16a   : > { %v1216_v13 = vmul.f32 0.0019569471, %v564_v32  ;;  %vm605_vm9 = vcmp.eq.f32.partialorder %v575_v21, 0.0  ;;  %v613_v0 = vand.u32 2147483648, %v1211_v20  ;;  %vm612_vm10 = vcmp.eq.f32.partialorder %v1211_v20, 0.0 }
 0x16b   : > { %991 = vrsqrt.f32 %v1214_v33  ;;  %v571_v36 = vadd.f32 %v570_v34, %v569_v29  ;;  %v583_v39 = vsel %vm582_vm1, %v572_v50, %v581_v35  ;;  %vm617_vm11 = vcmp.eq.f32.partialorder %v1214_v33, inf }
 0x16c   : > { %v984_v40 = vpop.eup %983  ;;  %993 = vrsqrt.f32 %v1216_v13  ;;  %v586_v41 = vsel %vm584_vm2, %v585_v14, %v583_v39  ;;  %v620_v16 = vand.u32 2147483648, %v1214_v33  ;;  %vm619_vm12 = vcmp.eq.f32.partialorder %v1214_v33, 0.0 }
 0x16d   : > { %v986_v42 = vpop.eup %985  ;;  %v1220_v43 = vmul.f32 0.0019569471, %v571_v36  ;;  %v636_v44 = vadd.f32 1e-10, %v586_v41  ;;  %v595_v45 = vmul.f32 %v984_v40, %v574_v1  ;;  %vm624_vm13 = vcmp.eq.f32.partialorder %v1216_v13, inf }
 0x16e   : > { %v588_v46 = vmul.f32 %v986_v42, %v573_v9  ;;  %v627_v22 = vand.u32 2147483648, %v1216_v13  ;;  %vm626_vm14 = vcmp.eq.f32.partialorder %v1216_v13, 0.0  ;;  %v663_v40 = vld [vmem:[%s1301_s1 + $0x6] sm:$0x3] }
 0x16f   : > { %995 = vrsqrt.f32 %v1220_v43  ;;  %v597_v30 = vsel %vm596_vm4, %v574_v1, %v595_v45  ;;  %vm631_vm15 = vcmp.eq.f32.partialorder %v1220_v43, inf  ;;  %v634_v35 = vand.u32 2147483648, %v1220_v43  ;;  %v664_v45 = vld [vmem:[%s1301_s1 + $0x8] sm:$0x3] }
 0x170   : > { %v988_v51 = vpop.eup %987  ;;  %997 = vrcp.f32 %v636_v44  ;;  %v590_v50 = vsel %vm589_vm3, %v573_v9, %v588_v46  ;;  %v600_v52 = vsel %vm598_vm5, %v599_v47, %v597_v30  ;;  %v660_v9 = vld [vmem:[%s1301_s1] sm:$0x3]  ;;  %vm633_vm0 = vcmp.eq.f32.partialorder %v1220_v43, 0.0  ;;  %v665_v47 = vld [vmem:[%s1301_s1 + $0xa] sm:$0x3] }
 0x171   : > { %v990_v53 = vpop.eup %989  ;;  %v593_v54 = vsel %vm591_vm6, %v592_v25, %v590_v50  ;;  %v609_v55 = vmul.f32 %v988_v51, %v1211_v20  ;;  %v638_v57 = vadd.f32 1e-10, %v600_v52  ;;  %v666_v51 = vld [vmem:[%s1301_s1 + $0xc] sm:$0x3] }
 0x172   : > { %v637_v56 = vadd.f32 1e-10, %v593_v54  ;;  %v602_v58 = vmul.f32 %v990_v53, %v575_v21  ;;  %v667_v53 = vld [vmem:[%s1301_s1 + $0xe] sm:$0x3] }
 0x173   : > { %v611_v6 = vsel %vm610_vm8, %v1211_v20, %v609_v55  ;;  %v661_v20 = vld [vmem:[%s1301_s1 + $0x2] sm:$0x3]  ;;  %v674_v55 = vld [vmem:[%s1302_s2 + $0xc] sm:$0x3] }
 0x174   : > { %999 = vrcp.f32 %v637_v56  ;;  %v604_v60 = vsel %vm603_vm7, %v575_v21, %v602_v58  ;;  %v614_v5 = vsel %vm612_vm10, %v613_v0, %v611_v6  ;;  %v795_v56 = vpop.permute.xlu0 %794 }
 0x175   : > { %v992_v61 = vpop.eup %991  ;;  %v607_v62 = vsel %vm605_vm9, %v606_v59, %v604_v60  ;;  %1001 = vrcp.f32 %v638_v57  ;;  %v640_v18 = vadd.f32 1e-10, %v614_v5  ;;  %v791_v57 = vpop.permute.xlu1 %790  ;;  %v1023_v59 = vmov 269488144  }
 0x176   : > { %v994_v1 = vpop.eup %993  ;;  %v639_v2 = vadd.f32 1e-10, %v607_v62  ;;  %v616_v4 = vmul.f32 %v992_v61, %v1214_v33  ;;  %v717_v60 = vunpack.c.l.s4 %v1023_v59 }
 0x177   : > { %v623_v11 = vmul.f32 %v994_v1, %v1216_v13 }
 0x178   : > { %v618_v10 = vsel %vm617_vm11, %v1214_v33, %v616_v4  ;;  %1003 = vrcp.f32 %v639_v2  ;;  %v662_v33 = vld [vmem:[%s1301_s1 + $0x4] sm:$0x3]  ;;  %v803_v58 = vpop.permute.xlu0 %802  ;;  %v718_v62 = vunpack.c.0.s8 %v717_v60 }
 0x179   : > { %v996_v15 = vpop.eup %995  ;;  %v621_v8 = vsel %vm619_vm12, %v620_v16, %v618_v10  ;;  %v625_v12 = vsel %vm624_vm13, %v1216_v13, %v623_v11  ;;  %1005 = vrcp.f32 %v640_v18  ;;  %v799_v6 = vpop.permute.xlu1 %798 }
 0x17a   : > { %v998_v17 = vpop.eup %997  ;;  %v630_v21 = vmul.f32 %v996_v15, %v1220_v43  ;;  %v641_v28 = vadd.f32 1e-10, %v621_v8  ;;  %v628_v31 = vsel %vm626_vm14, %v627_v22, %v625_v12  ;;  %v721_v0 = vsub.s32 %v718_v62, %v1054_v3 }
 0x17b   : > { %v676_v19 = vmul.f32 %v998_v17, %v660_v9  ;;  %v642_v14 = vadd.f32 1e-10, %v628_v31 }
 0x17c   : > { %v632_v34 = vsel %vm631_vm15, %v1220_v43, %v630_v21  ;;  %1007 = vrcp.f32 %v641_v28  ;;  %v811_v61 = vpop.permute.xlu0 %810  ;;  %v826_v5 = vrot.slane %v791_v57, %v721_v0  ;;  %v833_v11 = vrot.slane %v795_v56, %v721_v0 }
 0x17d   : > { %686 = vperm.xlu0 %980, %v676_v19   ;;  %v635_v36 = vsel %vm633_vm0, %v634_v35, %v632_v34  ;;  %1009 = vrcp.f32 %v642_v14  ;;  %v807_v1 = vpop.permute.xlu1 %806  ;;  %v840_v19 = vrot.slane %v799_v6, %v721_v0  ;;  %v847_v12 = vrot.slane %v803_v58, %v721_v0 }
 0x17e   : > { %v1000_v26 = vpop.eup %999  ;;  %v643_v41 = vadd.f32 1e-10, %v635_v36 }
 0x17f   : > { %v677_v29 = vmul.f32 %v1000_v26, %v661_v20  ;;  %v1002_v32 = vpop.eup %1001 }
 0x180   : > { %v678_v13 = vmul.f32 %v1002_v32, %v662_v33  ;;  %1011 = vrcp.f32 %v643_v41 }
 0x181   : > { %690 = vperm.xlu1 %979, %v677_v29   ;;  %818 = vperm.xlu0 %980, %v675_v27   ;;  %v854_v29 = vrot.slane %v807_v1, %v721_v0 }
 0x182   : > { %v1004_v39 = vpop.eup %1003 }
 0x183   : > { %v679_v42 = vmul.f32 %v1004_v39, %v663_v40  ;;  %v1006_v44 = vpop.eup %1005 }
 0x184   : > { %v680_v46 = vmul.f32 %v1006_v44, %v664_v45 }
 0x185   : > { %694 = vperm.xlu1 %979, %v678_v13  }
 0x186   : > { %v1008_v43 = vpop.eup %1007 }
 0x187   : > { %v681_v25 = vmul.f32 %v1008_v43, %v665_v47  ;;  %v1010_v30 = vpop.eup %1009 }
 0x188   : > { %v682_v50 = vmul.f32 %v1010_v30, %v666_v51 }
 0x189   : > { %698 = vperm.xlu1 %979, %v679_v42  }
 0x18a   : > { %v1012_v52 = vpop.eup %1011 }
 0x18b   : > { %v683_v54 = vmul.f32 %v1012_v52, %v667_v53 }
 0x18d   : > { %702 = vperm.xlu1 %979, %v680_v46  }
 0x191   : > { %706 = vperm.xlu1 %979, %v681_v25  }
 0x195   : > { %710 = vperm.xlu1 %979, %v682_v50  }
 0x199   : > { %714 = vperm.xlu1 %979, %v683_v54  }
 0x19d   : > { %814 = vperm.xlu1 %979, %v674_v55  }
 0x1fc   : > { %v687_v2 = vpop.permute.xlu0 %686 }
 0x1fd   : > { %v722_v4 = vrot.slane %v687_v2, %v721_v0 }
 0x1ff   : > { %v780_v9 = vmul.f32 %v722_v4, %v1125_v49 }
 0x200   : > { %v691_v10 = vpop.permute.xlu1 %690 }
 0x201   : > { %v884_v15 = vadd.f32 %v826_v5, %v780_v9  ;;  %v729_v16 = vrot.slane %v691_v10, %v721_v0 }
 0x203   : > { %892 = vst [vmem:[%s1280_s28] sm:$0xf] %v884_v15  ;;  %v781_v3 = vmul.f32 %v729_v16, %v1135_v63 }
 0x204   : > { %v695_v17 = vpop.permute.xlu1 %694 }
 0x205   : > { %v885_v18 = vadd.f32 %v833_v11, %v781_v3  ;;  %v736_v49 = vrot.slane %v695_v17, %v721_v0 }
 0x207   : > { %893 = vst [vmem:[%s1280_s28 + $0x4] sm:$0xf] %v885_v18  ;;  %v782_v8 = vmul.f32 %v736_v49, %v1122_v48  ;;  %v861_v48 = vrot.slane %v811_v61, %v721_v0 }
 0x208   : > { %v699_v20 = vpop.permute.xlu1 %698 }
 0x209   : > { %v886_v21 = vadd.f32 %v840_v19, %v782_v8  ;;  %v743_v22 = vrot.slane %v699_v20, %v721_v0 }
 0x20b   : > { %894 = vst [vmem:[%s1280_s28 + $0x8] sm:$0xf] %v886_v21  ;;  %v783_v26 = vmul.f32 %v743_v22, %v1132_v7  ;;  %v819_v7 = vpop.permute.xlu0 %818 }
 0x20c   : > { %v703_v27 = vpop.permute.xlu1 %702  ;;  %v875_v41 = vrot.slane %v819_v7, %v721_v0 }
 0x20d   : > { %v887_v28 = vadd.f32 %v847_v12, %v783_v26  ;;  %v750_v63 = vrot.slane %v703_v27, %v721_v0 }
 0x20f   : > { %895 = vst [vmem:[%s1280_s28 + $0xc] sm:$0xf] %v887_v28  ;;  %v784_v31 = vmul.f32 %v750_v63, %v1147_v23 }
 0x210   : > { %v707_v32 = vpop.permute.xlu1 %706 }
 0x211   : > { %v888_v33 = vadd.f32 %v854_v29, %v784_v31  ;;  %v757_v34 = vrot.slane %v707_v32, %v721_v0 }
 0x213   : > { %896 = vst [vmem:[%s1280_s28 + $0x10] sm:$0xf] %v888_v33  ;;  %v785_v35 = vmul.f32 %v757_v34, %v1150_v24 }
 0x214   : > { %v711_v14 = vpop.permute.xlu1 %710 }
 0x215   : > { %v889_v13 = vadd.f32 %v861_v48, %v785_v35  ;;  %v764_v39 = vrot.slane %v711_v14, %v721_v0 }
 0x217   : > { %897 = vst [vmem:[%s1280_s28 + $0x14] sm:$0xf] %v889_v13  ;;  %v786_v44 = vmul.f32 %v764_v39, %v1160_v37 }
 0x218   : > { %v715_v36 = vpop.permute.xlu1 %714 }
 0x219   : > { %v771_v40 = vrot.slane %v715_v36, %v721_v0 }
 0x21b   : > { %v787_v42 = vmul.f32 %v771_v40, %v1163_v38 }
 0x21c   : > { %v815_v23 = vpop.permute.xlu1 %814 }
 0x21d   : > { %v891_v45 = vadd.f32 %v875_v41, %v787_v42  ;;  %v868_v46 = vrot.slane %v815_v23, %v721_v0 }
 0x21f   : > { %899 = vst [vmem:[%s1280_s28 + $0x1c] sm:$0xf] %v891_v45  ;;  %v890_v43 = vadd.f32 %v868_v46, %v786_v44 }
 0x221   : > { %898 = vst [vmem:[%s1280_s28 + $0x18] sm:$0xf] %v890_v43 }
 0x222 PF: > { %s13_s12 = sadd.s32 1, %s1019_s12  }
 0x223   : > { %p10_p4 = scmp.ge.s32.totalorder %s13_s12, 4  }
 0x225   :  { %12 = sbr.rel (!%p10_p4) target bundleno = 1 (0x1), region = 62 }

</bundles_post_ra>
